<compile_context>
chip_gen: v6e
topology: v6e:2x2x1
jax: 0.10.0
libtpu: 0.0.40
codegen_flags: <defaults>
</compile_context>

<pallas_src>
import jax
import jax.numpy as jnp
from jax.experimental import pallas as pl
from jax.experimental.pallas import tpu as pltpu


def _add_pe_kernel(x_ref, pe_ref, o_ref):
    # Pure VPU broadcast add: pe's leading dim (1) broadcasts over the batch tile.
    o_ref[...] = x_ref[...] + pe_ref[...]


def _chip_budgets():
    """(block_budget_bytes, vmem_limit_bytes) tuned per TPU generation.

    v5e/v6e: 128 MiB VMEM -> ~8 MiB blocks, 64 MiB scoped limit.
    v7x: 64 MiB VMEM per TC -> keep 2 MiB blocks, 32 MiB limit.
    Falls back to the conservative (v7x-safe) setting if the query fails.
    """
    block_budget, vmem_limit = 2 << 20, 32 << 20
    try:
        info = pltpu.get_tpu_info()
        vmem_cap = getattr(info, "vmem_capacity_bytes", 0) or 0
        if vmem_cap >= (96 << 20):
            block_budget, vmem_limit = 8 << 20, 64 << 20
    except Exception:
        pass
    return block_budget, vmem_limit


def learnable_positional_encoding(x, pe, *, force_pallas=False,
                                  fuse_threshold_bytes=1 << 20):
    """out = x + pe, broadcasting pe (1,C,H,W) over the batch dim of x (N,C,H,W)."""
    N, C, H, W = x.shape
    assert pe.shape == (1, C, H, W)
    D = C * H * W
    itemsize = jnp.dtype(x.dtype).itemsize
    total_bytes = N * D * itemsize

    # Tiny inputs: custom-call fixed overhead dwarfs the HBM traffic -- let XLA
    # fuse the plain add unless the caller explicitly wants the Pallas path.
    if not force_pallas and total_bytes <= fuse_threshold_bytes:
        return x + pe

    block_budget, vmem_limit = _chip_budgets()

    cost = pl.CostEstimate(
        flops=N * D,
        transcendentals=0,
        bytes_accessed=(2 * N * D + D) * itemsize,
    )

    if D % 128 == 0:
        # 3-D lane+sublane dense view: trailing block dims tile exactly as
        # (8, 128) regardless of batch size -> full vregs, unmasked stores.
        G = D // 128
        x3 = x.reshape(N, G, 128)
        pe3 = pe.reshape(1, G, 128)

        # D-axis tile (robustness for huge C*H*W): multiple of 8 sublane groups.
        if G * 128 * itemsize <= block_budget:
            tile_g = G
        else:
            tile_g = max(8, (block_budget // (128 * itemsize)) // 8 * 8)
            tile_g = min(tile_g, G)
        grid_g = pl.cdiv(G, tile_g)

        # Row tile sized to the block budget.
        row_block_bytes = tile_g * 128 * itemsize
        tile_n = max(1, min(N, block_budget // row_block_bytes))
        # Megacore (v7x has 2 TCs): keep >=2 parallel grid steps for
        # medium/large inputs even if a single block would have fit.
        if tile_n == N and grid_g == 1 and N >= 2 and total_bytes > (4 << 20):
            tile_n = pl.cdiv(N, 2)
        grid_n = pl.cdiv(N, tile_n)

        out3 = pl.pallas_call(
            _add_pe_kernel,
            out_shape=jax.ShapeDtypeStruct((N, G, 128), x.dtype),
            grid_spec=pltpu.PrefetchScalarGridSpec(
                num_scalar_prefetch=0,
                grid=(grid_n, grid_g),
                in_specs=[
                    pl.BlockSpec((tile_n, tile_g, 128), lambda i, j: (i, j, 0)),
                    # pe broadcasts over the batch: constant along the i axis
                    # (fully resident when grid_g == 1).
                    pl.BlockSpec((1, tile_g, 128), lambda i, j: (0, j, 0)),
                ],
                out_specs=pl.BlockSpec((tile_n, tile_g, 128),
                                       lambda i, j: (i, j, 0)),
            ),
            compiler_params=pltpu.CompilerParams(
                dimension_semantics=("parallel", "parallel"),
                vmem_limit_bytes=vmem_limit,
            ),
            cost_estimate=cost,
        )(x3, pe3)
        return out3.reshape(N, C, H, W)

    # Fallback (D not a multiple of 128): 2-D lane view with full-D blocks.
    x2 = x.reshape(N, D)
    pe2 = pe.reshape(1, D)
    tile_n = max(1, min(N, block_budget // max(1, D * itemsize)))
    if tile_n < N:
        tile_n = min(N, max(8, (tile_n // 8) * 8))  # keep sublane dim 8-aligned
    grid_n = pl.cdiv(N, tile_n)

    out2 = pl.pallas_call(
        _add_pe_kernel,
        out_shape=jax.ShapeDtypeStruct((N, D), x.dtype),
        grid_spec=pltpu.PrefetchScalarGridSpec(
            num_scalar_prefetch=0,
            grid=(grid_n,),
            in_specs=[
                pl.BlockSpec((tile_n, D), lambda i: (i, 0)),
                pl.BlockSpec((1, D), lambda i: (0, 0)),
            ],
            out_specs=pl.BlockSpec((tile_n, D), lambda i: (i, 0)),
        ),
        compiler_params=pltpu.CompilerParams(
            dimension_semantics=("parallel",),
            vmem_limit_bytes=vmem_limit,
        ),
        cost_estimate=cost,
    )(x2, pe2)
    return out2.reshape(N, C, H, W)


if __name__ == "__main__":
    # Module config: in_channels=4, height=16, width=16; batch=2.
    N, C, H, W = 2, 4, 16, 16
    key = jax.random.PRNGKey(0)
    kx, kpe = jax.random.split(key)
    x = jax.random.normal(kx, (N, C, H, W), dtype=jnp.float32)
    # Deterministic init of the learnable parameter pe ~ randn(1, C, H, W)
    pe = jax.random.normal(kpe, (1, C, H, W), dtype=jnp.float32)

    # force_pallas=True so the Pallas kernel itself is exercised even at this
    # tiny (8 KiB) size; real callers below the threshold get the fused XLA add.
    out = learnable_positional_encoding(x, pe, force_pallas=True)
    out = jax.block_until_ready(out)

    # Correctness check vs plain-JAX broadcast add (same semantics as PyTorch).
    ref = x + pe
    assert out.shape == (N, C, H, W)
    assert jnp.allclose(out, ref, atol=1e-6), "mismatch vs reference"
    print("KERNEL_OK")
</pallas_src>

<mosaic_0001>
module attributes {stable_mosaic.version = 11 : i64} {
  func.func @_add_pe_kernel(%arg0: i32, %arg1: i32, %arg2: memref<2x8x128xf32, #tpu.memory_space<vmem>>, %arg3: memref<1x8x128xf32, #tpu.memory_space<vmem>>, %arg4: memref<2x8x128xf32, #tpu.memory_space<vmem>>) attributes {dimension_semantics = [#tpu.dimension_semantics<parallel>, #tpu.dimension_semantics<parallel>], iteration_bounds = array<i64: 1, 1>, scalar_prefetch = 0 : i64, scratch_operands = 0 : i64, tpu.core_type = #tpu.core_type<tc>, window_params = [{transform_indices = @transform_0, window_bounds = array<i64: 2, 8, 128>}, {transform_indices = @transform_1, window_bounds = array<i64: 1, 8, 128>}, {transform_indices = @transform_2, window_bounds = array<i64: 2, 8, 128>}]} {
    %c0 = arith.constant 0 : index
    %c0_0 = arith.constant 0 : index
    %c0_1 = arith.constant 0 : index
    %0 = vector.load %arg2[%c0, %c0_0, %c0_1] : memref<2x8x128xf32, #tpu.memory_space<vmem>>, vector<2x8x128xf32>
    %c0_2 = arith.constant 0 : index
    %c0_3 = arith.constant 0 : index
    %c0_4 = arith.constant 0 : index
    %1 = vector.load %arg3[%c0_2, %c0_3, %c0_4] : memref<1x8x128xf32, #tpu.memory_space<vmem>>, vector<1x8x128xf32>
    %2 = vector.broadcast %1 : vector<1x8x128xf32> to vector<2x8x128xf32>
    %3 = arith.addf %0, %2 : vector<2x8x128xf32>
    %c0_5 = arith.constant 0 : index
    %c0_6 = arith.constant 0 : index
    %c0_7 = arith.constant 0 : index
    %4 = vector.load %arg4[%c0_5, %c0_6, %c0_7] : memref<2x8x128xf32, #tpu.memory_space<vmem>>, vector<2x8x128xf32>
    tpu.vector_store %arg4[%c0_5, %c0_6, %c0_7], %3 {strides = array<i32>} : memref<2x8x128xf32, #tpu.memory_space<vmem>>, vector<2x8x128xf32>,
    return
  }
  func.func @transform_0(%arg0: i32, %arg1: i32) -> (i32, i32, i32) {
    %c0_i32 = arith.constant 0 : i32
    %c0_i32_0 = arith.constant 0 : i32
    return %arg0, %arg1, %c0_i32 : i32, i32, i32
  }
  func.func @transform_1(%arg0: i32, %arg1: i32) -> (i32, i32, i32) {
    %c0_i32 = arith.constant 0 : i32
    %c0_i32_0 = arith.constant 0 : i32
    %c0_i32_1 = arith.constant 0 : i32
    return %c0_i32, %arg1, %c0_i32_0 : i32, i32, i32
  }
  func.func @transform_2(%arg0: i32, %arg1: i32) -> (i32, i32, i32) {
    %c0_i32 = arith.constant 0 : i32
    %c0_i32_0 = arith.constant 0 : i32
    return %arg0, %arg1, %c0_i32 : i32, i32, i32
  }
}

</mosaic_0001>

<bundles_post_ra>
// kernel: tpu_custom_call.1
= control target key start
LH: loop header
LB: loop body
LE: loop exit
PB: predicated region body
PF: predicated region fallthrough
CT: control target
= control target key end

     0   :  { %7 = vsyncpa [#allocation3], 0  ;;  %s169_s0 = inlined_call_operand.hbm [shape: f32[2,8,128], index: 0, kind: input, shape index: {}]   ;;  %s170_s1 = inlined_call_operand.hbm [shape: f32[1,8,128], index: 1, kind: input, shape index: {}]   ;;  %s171_s2 = inlined_call_operand.hbm [shape: f32[2,8,128], index: 2, kind: output, shape index: {}]  }
   0x1   :  { %8 = vsyncpa [#allocation6], 0 }
   0x2   :  { %9 = vsyncpa [#allocation4], 0  ;;  %s134_s9 = smov [#allocation2]  }
   0x3   :  { %s15_s10 = sshll.u32 %s134_s9, 4  ;;  %s16_s10 = int_to_ptr.vmem [resolvable:$true] %s15_s10 }
   0x4   :  { %s76_s11 = scalar_lea.vmem %s16_s10, 256  ;;  %p81_p1 = scmp.lt.s32.totalorder %s16_s10, %s16_s10 }
   0x5   :  { %p77_p0 = scmp.ne.s32.totalorder %s16_s10, %s76_s11  ;;  %p82_p2 = scmp.lt.s32.totalorder %s76_s11, %s76_s11 }
   0x7   :  { %p83_p3 = por %p82_p2, %p81_p1 }
   0x9   :  { %p84_p4 = pnand %p83_p3, %p77_p0 }
   0xb   :  { %87 = shalt.err (!%p84_p4)
}
   0xc   :  { %s135_s12 = smov 128   ;;  %s136_s13 = smov 8  }
   0xd   :  { %21 = dma.hbm_to_vmem [thread:$0]  %s169_s0, 256, %s16_s10, [#allocation3], %s135_s12, %s135_s12, %s136_s13  }
   0xe   :  { %s137_s16 = smov [#allocation5]  }
   0xf   :  { %s28_s17 = sshll.u32 %s137_s16, 4  ;;  %s29_s17 = int_to_ptr.vmem [resolvable:$true] %s28_s17 }
  0x10   :  { %s96_s18 = scalar_lea.vmem %s29_s17, 128  ;;  %p101_p6 = scmp.lt.s32.totalorder %s29_s17, %s29_s17 }
  0x11   :  { %p97_p5 = scmp.ne.s32.totalorder %s29_s17, %s96_s18  ;;  %p102_p7 = scmp.lt.s32.totalorder %s96_s18, %s96_s18 }
  0x13   :  { %p103_p8 = por %p102_p7, %p101_p6 }
  0x15   :  { %p104_p9 = pnand %p103_p8, %p97_p5 }
  0x17   :  { %107 = shalt.err (!%p104_p9)
}
  0x18   :  { %31 = dma.hbm_to_vmem [thread:$0]  %s170_s1, 128, %s29_s17, [#allocation6]  }
  0x19   :  { %128 = dma.done.wait [#allocation3], 256  }
  0x1a   :  { %129 = vsyncadd [#allocation3], 4294967040 }
  0x1b   :  { %130 = dma.done.wait [#allocation6], 128  }
  0x1c   :  { %131 = vsyncadd [#allocation6], 4294967168  ;;  %s138_s21 = smov [#allocation7]   ;;  %v38_v0 = vld [vmem:[#allocation2] sm:$0xff]  ;;  %v40_v1 = vld [vmem:[#allocation5] sm:$0xff] }
  0x1d   :  { %s50_s0 = sshll.u32 %s138_s21, 4  ;;  %v39_v2 = vld [vmem:[#allocation2 + $0x8] sm:$0xff]  ;;  %v41_v3 = vadd.f32 %v40_v1, %v38_v0  ;;  %s51_s0 = int_to_ptr.vmem [resolvable:$true] %s50_s0 }
  0x1e   :  { %v42_v4 = vadd.f32 %v40_v1, %v39_v2  ;;  %s108_s22 = scalar_lea.vmem %s51_s0, 256  ;;  %p113_p11 = scmp.lt.s32.totalorder %s51_s0, %s51_s0 }
  0x1f   :  { %43 = vst [vmem:[#allocation7] sm:$0xff] %v41_v3  ;;  %p109_p10 = scmp.ne.s32.totalorder %s51_s0, %s108_s22  ;;  %p114_p12 = scmp.lt.s32.totalorder %s108_s22, %s108_s22 }
  0x20   :  { %44 = vst [vmem:[#allocation7 + $0x8] sm:$0xff] %v42_v4 }
  0x21   :  { %p115_p13 = por %p114_p12, %p113_p11 }
  0x23   :  { %p116_p0 = pnand %p115_p13, %p109_p10 }
  0x25   :  { %119 = shalt.err (!%p116_p0)
}
  0x26   :  { %56 = dma.vmem_to_hbm [thread:$0]  %s51_s0, 256, %s171_s2, [#allocation4], %s135_s12, %s135_s12, %s136_s13  }
  0x27   :  { %132 = dma.done.wait [#allocation4], 256  }
  0x28   :  { %133 = vsyncadd [#allocation4], 4294967040 }
  0x29   :  { %60 = vsyncpa [#allocation3], 1 }
  0x2a   :  { %61 = vsyncpa [#allocation6], 1 }
  0x2b   :  { %62 = vsyncpa [#allocation4], 1 }

</bundles_post_ra>
